<compile_context>
chip_gen: v7x
topology: tpu7x:2x2x1
jax: 0.10.0
libtpu: 0.0.40
codegen_flags: <defaults>
</compile_context>

<pallas_src>
import functools

import jax
import jax.numpy as jnp
from jax.experimental import pallas as pl
from jax.experimental.pallas import tpu as pltpu


LANES = 128
MAX_TILE_ROWS = 4096   # 4096 x 128 f32 = 2 MiB per input tile


def _cdiv(a, b):
    return -(-a // b)


def _num_tensorcores():
    """1 on single-TC chips (v5e/v6e); 2 on v7x (two TensorCores per chip)."""
    try:
        kind = jax.devices()[0].device_kind.lower()
    except Exception:
        return 1
    return 2 if "v7" in kind else 1


def _as_stream_dtype(a):
    # Stream floats in their native dtype (kernel casts to f32); only promote
    # exotic dtypes.  No cross-input astype (avoids an extra HBM copy of y).
    if a.dtype in (jnp.float32, jnp.bfloat16, jnp.float16):
        return a
    return a.astype(jnp.float32)


def _closs_kernel(x_ref, y_ref, o_ref, acc_ref, *,
                  delta2, tile_rows, tiles_per_split, lane_rows):
    c = pl.program_id(0)
    i = pl.program_id(1)

    @pl.when(i == 0)
    def _():
        acc_ref[...] = jnp.zeros_like(acc_ref)

    # Cast inside the kernel (inputs may be bf16/f16 to halve HBM traffic).
    x = x_ref[...].astype(jnp.float32)
    y = y_ref[...].astype(jnp.float32)
    d = x - y
    # VPU (sub/mul/add) + EUP (sqrt) only in the steady state.
    err = jnp.sqrt(d * d + delta2)

    # Logical (unclamped) tile index and the number of valid rows in it.
    blk = c * tiles_per_split + i
    valid = lane_rows - blk * tile_rows

    @pl.when(valid >= tile_rows)        # full tile: hot path, no mask
    def _():
        acc_ref[...] += err

    @pl.when(valid < tile_rows)         # partial final tile / dead step
    def _():
        rows = jax.lax.broadcasted_iota(jnp.int32, err.shape, 0)
        acc_ref[...] += jnp.where(rows < valid, err, 0.0)

    @pl.when(i == pl.num_programs(1) - 1)
    def _():
        # One cross-sublane reduce per split: (tile_rows, 128) -> (1, 128).
        o_ref[0] = jnp.sum(acc_ref[...], axis=0, keepdims=True)


def charbonnier_loss(x, y, delta=0.001, num_splits=None):
    assert x.shape == y.shape, (x.shape, y.shape)
    delta2 = float(delta) * float(delta)

    xf = _as_stream_dtype(x.reshape(-1))
    yf = _as_stream_dtype(y.reshape(-1))
    n_real = int(xf.size)

    if num_splits is None:
        num_splits = _num_tensorcores()

    lane_rows = n_real // LANES
    rem = n_real - lane_rows * LANES

    # Sub-lane-row remainder (< 128 elements): tiny fused jnp expression.
    if rem:
        xt = xf[lane_rows * LANES:].astype(jnp.float32)
        yt = yf[lane_rows * LANES:].astype(jnp.float32)
        dt = xt - yt
        tail_sum = jnp.sum(jnp.sqrt(dt * dt + delta2))
    else:
        tail_sum = jnp.float32(0.0)

    if lane_rows == 0:
        # Fewer than 128 elements total: nothing for the kernel to stream.
        return tail_sum / jnp.float32(n_real)

    # Lane-dense slab (lane_rows, 128). Pure bitcast when n_real % 128 == 0.
    x2d = xf[: lane_rows * LANES].reshape(lane_rows, LANES)
    y2d = yf[: lane_rows * LANES].reshape(lane_rows, LANES)

    # Dtype-aware row alignment (16 for packed 16-bit sublanes).
    row_align = 16 if (xf.dtype.itemsize < 4 or yf.dtype.itemsize < 4) else 8
    rows_per_split = _cdiv(lane_rows, num_splits)
    tile_rows = max(row_align,
                    min(MAX_TILE_ROWS,
                        _cdiv(rows_per_split, row_align) * row_align))

    total_tiles = _cdiv(lane_rows, tile_rows)      # last tile may be partial
    tiles_per_split = _cdiv(total_tiles, num_splits)
    last_tile = total_tiles - 1

    def in_index_map(c, i):
        # Clamp dead steps (only when num_splits doesn't divide total_tiles)
        # onto the last real tile; the kernel masks their contribution to 0.
        return (jnp.minimum(c * tiles_per_split + i, last_tile), 0)

    kernel = functools.partial(
        _closs_kernel, delta2=delta2, tile_rows=tile_rows,
        tiles_per_split=tiles_per_split, lane_rows=lane_rows)

    partials = pl.pallas_call(
        kernel,
        out_shape=jax.ShapeDtypeStruct((num_splits, 1, LANES), jnp.float32),
        grid_spec=pltpu.PrefetchScalarGridSpec(
            num_scalar_prefetch=0,
            grid=(num_splits, tiles_per_split),
            in_specs=[
                pl.BlockSpec((tile_rows, LANES), in_index_map),
                pl.BlockSpec((tile_rows, LANES), in_index_map),
            ],
            out_specs=pl.BlockSpec((1, 1, LANES), lambda c, i: (c, 0, 0)),
            scratch_shapes=[pltpu.VMEM((tile_rows, LANES), jnp.float32)],
        ),
        compiler_params=pltpu.CompilerParams(
            dimension_semantics=("parallel", "arbitrary"),
        ),
    )(x2d, y2d)

    total = jnp.sum(partials) + tail_sum
    return total / jnp.float32(n_real)


if __name__ == "__main__":
    key = jax.random.PRNGKey(0)
    kx, ky = jax.random.split(key)

    # Small NCHW inputs consistent with a super-resolution output/target pair.
    X = jax.random.normal(kx, (2, 4, 16, 16), dtype=jnp.float32)
    Y = jax.random.normal(ky, (2, 4, 16, 16), dtype=jnp.float32)

    loss = charbonnier_loss(X, Y, delta=0.001)
    jax.block_until_ready(loss)

    diff = X - Y
    ref = jnp.mean(jnp.sqrt(diff * diff + 0.001 * 0.001))
    assert jnp.allclose(loss, ref, rtol=1e-5, atol=1e-6), (loss, ref)

    # Ragged size: exercises the in-kernel row mask (partial final tile) and
    # the <128-element fused jnp tail.
    Xr = jax.random.normal(kx, (3, 3, 7, 11), dtype=jnp.float32)
    Yr = jax.random.normal(ky, (3, 3, 7, 11), dtype=jnp.float32)
    loss_r = charbonnier_loss(Xr, Yr, delta=0.001)
    jax.block_until_ready(loss_r)
    dr = Xr - Yr
    ref_r = jnp.mean(jnp.sqrt(dr * dr + 0.001 * 0.001))
    assert jnp.allclose(loss_r, ref_r, rtol=1e-5, atol=1e-6), (loss_r, ref_r)

    print("KERNEL_OK")
</pallas_src>

<mosaic_0001>
module attributes {stable_mosaic.version = 11 : i64} {
  func.func @_closs_kernel(%arg0: i32, %arg1: i32, %arg2: memref<16x128xf32, #tpu.memory_space<vmem>>, %arg3: memref<16x128xf32, #tpu.memory_space<vmem>>, %arg4: memref<1x1x128xf32, #tpu.memory_space<vmem>>, %arg5: memref<16x128xf32, #tpu.memory_space<vmem>>) attributes {dimension_semantics = [#tpu.dimension_semantics<parallel>, #tpu.dimension_semantics<arbitrary>], iteration_bounds = array<i64: 1, 1>, scalar_prefetch = 0 : i64, scratch_operands = 1 : i64, tpu.core_type = #tpu.core_type<tc>, window_params = [{transform_indices = @transform_0, window_bounds = array<i64: 16, 128>}, {transform_indices = @transform_1, window_bounds = array<i64: 16, 128>}, {transform_indices = @transform_2, window_bounds = array<i64: 1, 1, 128>}]} {
    %c0_i32 = arith.constant 0 : i32
    %0 = arith.cmpi eq, %arg1, %c0_i32 : i32
    %1 = arith.extui %0 : i1 to i32
    %c0_i32_0 = arith.constant 0 : i32
    %2 = arith.cmpi ne, %1, %c0_i32_0 : i32
    scf.if %2 {
      %cst_11 = arith.constant 0.000000e+00 : f32
      %23 = vector.broadcast %cst_11 : f32 to vector<16x128xf32>
      %c0_12 = arith.constant 0 : index
      %c0_13 = arith.constant 0 : index
      %24 = vector.load %arg5[%c0_12, %c0_13] : memref<16x128xf32, #tpu.memory_space<vmem>>, vector<16x128xf32>
      tpu.vector_store %arg5[%c0_12, %c0_13], %23 {strides = array<i32>} : memref<16x128xf32, #tpu.memory_space<vmem>>, vector<16x128xf32>,
    } else {
    }
    %c0 = arith.constant 0 : index
    %c0_1 = arith.constant 0 : index
    %3 = vector.load %arg2[%c0, %c0_1] : memref<16x128xf32, #tpu.memory_space<vmem>>, vector<16x128xf32>
    %c0_2 = arith.constant 0 : index
    %c0_3 = arith.constant 0 : index
    %4 = vector.load %arg3[%c0_2, %c0_3] : memref<16x128xf32, #tpu.memory_space<vmem>>, vector<16x128xf32>
    %5 = arith.subf %3, %4 : vector<16x128xf32>
    %6 = arith.mulf %5, %5 : vector<16x128xf32>
    %cst = arith.constant 9.99999997E-7 : f32
    %7 = vector.broadcast %cst : f32 to vector<16x128xf32>
    %8 = arith.addf %6, %7 : vector<16x128xf32>
    %9 = math.sqrt %8 : vector<16x128xf32>
    %c1_i32 = arith.constant 1 : i32
    %10 = arith.muli %arg0, %c1_i32 : i32
    %11 = arith.addi %10, %arg1 : i32
    %c16_i32 = arith.constant 16 : i32
    %12 = arith.muli %11, %c16_i32 : i32
    %c16_i32_4 = arith.constant 16 : i32
    %13 = arith.subi %c16_i32_4, %12 : i32
    %c16_i32_5 = arith.constant 16 : i32
    %14 = arith.cmpi sge, %13, %c16_i32_5 : i32
    %15 = arith.extui %14 : i1 to i32
    %c0_i32_6 = arith.constant 0 : i32
    %16 = arith.cmpi ne, %15, %c0_i32_6 : i32
    scf.if %16 {
      %c0_11 = arith.constant 0 : index
      %c0_12 = arith.constant 0 : index
      %23 = vector.load %arg5[%c0_11, %c0_12] : memref<16x128xf32, #tpu.memory_space<vmem>>, vector<16x128xf32>
      %24 = arith.addf %23, %9 : vector<16x128xf32>
      %c0_13 = arith.constant 0 : index
      %c0_14 = arith.constant 0 : index
      %25 = vector.load %arg5[%c0_13, %c0_14] : memref<16x128xf32, #tpu.memory_space<vmem>>, vector<16x128xf32>
      tpu.vector_store %arg5[%c0_13, %c0_14], %24 {strides = array<i32>} : memref<16x128xf32, #tpu.memory_space<vmem>>, vector<16x128xf32>,
    } else {
    }
    %c16_i32_7 = arith.constant 16 : i32
    %17 = arith.cmpi slt, %13, %c16_i32_7 : i32
    %18 = arith.extui %17 : i1 to i32
    %c0_i32_8 = arith.constant 0 : i32
    %19 = arith.cmpi ne, %18, %c0_i32_8 : i32
    scf.if %19 {
      %23 = tpu.iota {dimensions = array<i32: 0>} : vector<16x128xi32>
      %c0_11 = arith.constant 0 : index
      %c0_12 = arith.constant 0 : index
      %24 = vector.load %arg5[%c0_11, %c0_12] : memref<16x128xf32, #tpu.memory_space<vmem>>, vector<16x128xf32>
      %25 = vector.broadcast %13 : i32 to vector<16x128xi32>
      %26 = arith.cmpi slt, %23, %25 : vector<16x128xi32>
      %cst_13 = arith.constant 0.000000e+00 : f32
      %27 = vector.broadcast %cst_13 : f32 to vector<16x128xf32>
      %28 = arith.select %26, %9, %27 : vector<16x128xi1>, vector<16x128xf32>
      %29 = arith.addf %24, %28 : vector<16x128xf32>
      %c0_14 = arith.constant 0 : index
      %c0_15 = arith.constant 0 : index
      %30 = vector.load %arg5[%c0_14, %c0_15] : memref<16x128xf32, #tpu.memory_space<vmem>>, vector<16x128xf32>
      tpu.vector_store %arg5[%c0_14, %c0_15], %29 {strides = array<i32>} : memref<16x128xf32, #tpu.memory_space<vmem>>, vector<16x128xf32>,
    } else {
    }
    %c0_i32_9 = arith.constant 0 : i32
    %20 = arith.cmpi eq, %arg1, %c0_i32_9 : i32
    %21 = arith.extui %20 : i1 to i32
    %c0_i32_10 = arith.constant 0 : i32
    %22 = arith.cmpi ne, %21, %c0_i32_10 : i32
    scf.if %22 {
      %c0_11 = arith.constant 0 : index
      %c0_12 = arith.constant 0 : index
      %23 = vector.load %arg5[%c0_11, %c0_12] : memref<16x128xf32, #tpu.memory_space<vmem>>, vector<16x128xf32>
      %cst_13 = arith.constant dense<0.000000e+00> : vector<128xf32>
      %24 = vector.multi_reduction <add>, %23, %cst_13 [0] : vector<16x128xf32> to vector<128xf32>
      %25 = vector.shape_cast %24 : vector<128xf32> to vector<1x128xf32>
      %c0_14 = arith.constant 0 : index
      %c0_15 = arith.constant 0 : index
      %c0_16 = arith.constant 0 : index
      %26 = vector.load %arg4[%c0_14, %c0_15, %c0_16] : memref<1x1x128xf32, #tpu.memory_space<vmem>>, vector<1x1x128xf32>
      %27 = vector.shape_cast %26 : vector<1x1x128xf32> to vector<1x128xf32>
      %28 = vector.shape_cast %25 : vector<1x128xf32> to vector<1x1x128xf32>
      tpu.vector_store %arg4[%c0_14, %c0_15, %c0_16], %28 {strides = array<i32>} : memref<1x1x128xf32, #tpu.memory_space<vmem>>, vector<1x1x128xf32>,
    } else {
    }
    return
  }
  func.func @transform_0(%arg0: i32, %arg1: i32) -> (i32, i32) {
    %c1_i32 = arith.constant 1 : i32
    %0 = arith.muli %arg0, %c1_i32 : i32
    %1 = arith.addi %0, %arg1 : i32
    %c0_i32 = arith.constant 0 : i32
    %2 = arith.minsi %1, %c0_i32 : i32
    %c0_i32_0 = arith.constant 0 : i32
    %c0_i32_1 = arith.constant 0 : i32
    return %2, %c0_i32_0 : i32, i32
  }
  func.func @transform_1(%arg0: i32, %arg1: i32) -> (i32, i32) {
    %c1_i32 = arith.constant 1 : i32
    %0 = arith.muli %arg0, %c1_i32 : i32
    %1 = arith.addi %0, %arg1 : i32
    %c0_i32 = arith.constant 0 : i32
    %2 = arith.minsi %1, %c0_i32 : i32
    %c0_i32_0 = arith.constant 0 : i32
    %c0_i32_1 = arith.constant 0 : i32
    return %2, %c0_i32_0 : i32, i32
  }
  func.func @transform_2(%arg0: i32, %arg1: i32) -> (i32, i32, i32) {
    %c0_i32 = arith.constant 0 : i32
    %c0_i32_0 = arith.constant 0 : i32
    %c0_i32_1 = arith.constant 0 : i32
    return %arg0, %c0_i32, %c0_i32_0 : i32, i32, i32
  }
}

</mosaic_0001>

<bundles_post_ra>
// kernel: tpu_custom_call.1
= control target key start
LH: loop header
LB: loop body
LE: loop exit
PB: predicated region body
PF: predicated region fallthrough
CT: control target
= control target key end

     0   :  { %7 = vsyncpa [#allocation4], 0  ;;  %s291_s0 = inlined_call_operand.hbm [shape: f32[16,128], index: 0, kind: input, shape index: {}]   ;;  %s292_s1 = inlined_call_operand.hbm [shape: f32[16,128], index: 1, kind: input, shape index: {}]   ;;  %s293_s2 = inlined_call_operand.hbm [shape: f32[1,1,128], index: 2, kind: output, shape index: {}]  }
   0x1   :  { %8 = vsyncpa [#allocation7], 0 }
   0x2   :  { %9 = vsyncpa [#allocation5], 0  ;;  %s235_s9 = smov [#allocation3]   ;;  %s163_s13 = scalar_lea.hbm %s291_s0, 256 }
   0x3   :  { %s21_s10 = sshll.u32 %s235_s9, 4  ;;  %p164_p0 = scmp.ne.s32.totalorder %s291_s0, %s163_s13  ;;  %s22_s10 = int_to_ptr.vmem [resolvable:$true] %s21_s10 }
   0x4   :  { %p167_p1 = scmp.lt.u32.totalorder %s163_s13, %s291_s0 }
   0x6   :  { %p169_p2 = pnand %p167_p1, %p164_p0 }
   0x8   :  { %172 = shalt.err (!%p169_p2)
}
   0x9   :  { %s173_s18 = scalar_lea.vmem %s22_s10, 256  ;;  %p178_p4 = scmp.lt.s32.totalorder %s22_s10, %s22_s10 }
   0xa   :  { %p174_p3 = scmp.ne.s32.totalorder %s22_s10, %s173_s18  ;;  %p179_p5 = scmp.lt.s32.totalorder %s173_s18, %s173_s18 }
   0xc   :  { %p180_p6 = por %p179_p5, %p178_p4 }
   0xe   :  { %p181_p7 = pnand %p180_p6, %p174_p3 }
  0x10   :  { %184 = shalt.err (!%p181_p7)
}
  0x11   :  { %s236_s19 = smov 128   ;;  %s237_s20 = smov 8  }
  0x12   :  { %27 = dma.hbm_to_vmem [thread:$0]  %s291_s0, 256, %s22_s10, [#allocation4], %s236_s19, %s236_s19, %s237_s20  }
  0x13   :  { %s238_s23 = smov [#allocation6]   ;;  %s185_s27 = scalar_lea.hbm %s292_s1, 256 }
  0x14   :  { %s39_s24 = sshll.u32 %s238_s23, 4  ;;  %p186_p8 = scmp.ne.s32.totalorder %s292_s1, %s185_s27  ;;  %s40_s24 = int_to_ptr.vmem [resolvable:$true] %s39_s24 }
  0x15   :  { %p189_p9 = scmp.lt.u32.totalorder %s185_s27, %s292_s1 }
  0x17   :  { %p191_p10 = pnand %p189_p9, %p186_p8 }
  0x19   :  { %194 = shalt.err (!%p191_p10)
}
  0x1a   :  { %s195_s4 = scalar_lea.vmem %s40_s24, 256  ;;  %p200_p12 = scmp.lt.s32.totalorder %s40_s24, %s40_s24 }
  0x1b   :  { %p196_p11 = scmp.ne.s32.totalorder %s40_s24, %s195_s4  ;;  %p201_p13 = scmp.lt.s32.totalorder %s195_s4, %s195_s4 }
  0x1d   :  { %p202_p0 = por %p201_p13, %p200_p12 }
  0x1f   :  { %p203_p1 = pnand %p202_p0, %p196_p11 }
  0x21   :  { %206 = shalt.err (!%p203_p1)
}
  0x22   :  { %45 = dma.hbm_to_vmem [thread:$0]  %s292_s1, 256, %s40_s24, [#allocation7], %s236_s19, %s236_s19, %s237_s20  }
  0x23   :  { %229 = dma.done.wait [#allocation4], 256  }
  0x24   :  { %230 = vsyncadd [#allocation4], 4294967040 }
  0x25   :  { %231 = dma.done.wait [#allocation7], 256  }
  0x26   :  { %232 = vsyncadd [#allocation7], 4294967040  ;;  %v66_v0 = vld [vmem:[#allocation3] sm:$0xff]  ;;  %v67_v1 = vld [vmem:[#allocation3 + $0x8] sm:$0xff]  ;;  %s239_s1 = smov [#allocation8]  }
  0x27   :  { %v68_v2 = vld [vmem:[#allocation6] sm:$0xff]  ;;  %v69_v3 = vld [vmem:[#allocation6 + $0x8] sm:$0xff]  ;;  %s140_s6 = sshll.u32 %s239_s1, 4  ;;  %s141_s6 = int_to_ptr.vmem [resolvable:$true] %s140_s6 }
  0x28   :  { %v70_v4 = vsub.f32 %v66_v0, %v68_v2  ;;  %v71_v5 = vsub.f32 %v67_v1, %v69_v3  ;;  %s207_s7 = scalar_lea.vmem %s141_s6, 16  ;;  %s211_s8 = scalar_lea.vmem %s141_s6, 32 }
  0x29   :  { %p208_p2 = scmp.ne.s32.totalorder %s141_s6, %s207_s7  ;;  %p212_p3 = scmp.lt.s32.totalorder %s141_s6, %s141_s6 }
  0x2a   :  { %v72_v6 = vmul.f32 %v70_v4, %v70_v4  ;;  %v73_v7 = vmul.f32 %v71_v5, %v71_v5  ;;  %p213_p4 = scmp.lt.s32.totalorder %s211_s8, %s207_s7 }
  0x2c   :  { %v74_v8 = vadd.f32 1e-06, %v72_v6  ;;  %v75_v9 = vadd.f32 1e-06, %v73_v7  ;;  %p214_p5 = por %p213_p4, %p212_p3 }
  0x2e   :  { %159 = vrsqrt.f32 %v74_v8  ;;  %vm78_vm0 = vcmp.eq.f32.partialorder %v74_v8, inf  ;;  %v81_v11 = vand.u32 2147483648, %v74_v8  ;;  %vm80_vm1 = vcmp.eq.f32.partialorder %v74_v8, 0.0  ;;  %p215_p6 = pnand %p214_p5, %p208_p2 }
  0x2f   :  { %161 = vrsqrt.f32 %v75_v9  ;;  %vm85_vm2 = vcmp.eq.f32.partialorder %v75_v9, inf  ;;  %v88_v14 = vand.u32 2147483648, %v75_v9  ;;  %vm87_vm3 = vcmp.eq.f32.partialorder %v75_v9, 0.0 }
  0x38   :  { %v160_v10 = vpop.eup %159 }
  0x39   :  { %v162_v12 = vpop.eup %161  ;;  %v77_v13 = vmul.f32 %v160_v10, %v74_v8 }
  0x3a   :  { %v84_v15 = vmul.f32 %v162_v12, %v75_v9 }
  0x3b   :  { %v79_v16 = vsel %vm78_vm0, %v74_v8, %v77_v13 }
  0x3c   :  { %v82_v17 = vsel %vm80_vm1, %v81_v11, %v79_v16  ;;  %v86_v18 = vsel %vm85_vm2, %v75_v9, %v84_v15 }
  0x3d   :  { %v89_v19 = vsel %vm87_vm3, %v88_v14, %v86_v18 }
  0x3e   :  { %v126_v20 = vadd.f32 %v89_v19, %v82_v17 }
  0x40   :  { %v127_v21 = vrot.slane %v126_v20, 4 }
  0x42   :  { %v128_v22 = vadd.f32 %v127_v21, %v126_v20 }
  0x44   :  { %v129_v23 = vrot.slane %v128_v22, 2 }
  0x46   :  { %v130_v24 = vadd.f32 %v129_v23, %v128_v22 }
  0x48   :  { %v131_v25 = vrot.slane %v130_v24, 1 }
  0x4a   :  { %v132_v26 = vadd.f32 %v131_v25, %v130_v24 }
  0x4c   :  { %133 = vst [vmem:[#allocation8] sm:$0x1] %v132_v26 }
  0x4d   :  { %218 = shalt.err (!%p215_p6)
}
  0x4e   :  { %s219_s11 = scalar_lea.hbm %s293_s2, 16 }
  0x4f   :  { %p220_p7 = scmp.ne.s32.totalorder %s293_s2, %s219_s11  ;;  %p223_p8 = scmp.lt.u32.totalorder %s219_s11, %s293_s2 }
  0x51   :  { %p225_p9 = pnand %p223_p8, %p220_p7 }
  0x53   :  { %228 = shalt.err (!%p225_p9)
}
  0x54   :  { %143 = dma.vmem_to_hbm [thread:$0]  %s141_s6, 16, %s293_s2, [#allocation5]  }
  0x55   :  { %233 = dma.done.wait [#allocation5], 16  }
  0x56   :  { %234 = vsyncadd [#allocation5], 4294967280 }
  0x57   :  { %147 = vsyncpa [#allocation4], 1 }
  0x58   :  { %148 = vsyncpa [#allocation7], 1 }
  0x59   :  { %149 = vsyncpa [#allocation5], 1 }

</bundles_post_ra>
